<compile_context>
chip_gen: v5e
topology: v5e:2x2
jax: 0.10.0
libtpu: 0.0.40
codegen_flags: <defaults>
</compile_context>

<pallas_src>
import functools

import jax
import jax.numpy as jnp
from jax import lax
from jax.experimental import pallas as pl
from jax.experimental.pallas import tpu as pltpu


def _round_up(x, m):
    return -(-x // m) * m


def pack_params(params, num_units):
    """Pack all layer parameters into one (rows_pad, cols_pad) f32 block.

    params: PyTorch-layout list [(W1,(U,1), b1,(U,)), (Wk,(U,U), bk,(U,))...,
            (W_out,(1,U), b_out,(1,))].

    Column layout (rows = hidden units):
      cols [0, (L-1)*U)            : hidden-layer >=2 weights, (U, U) each
      col  base + 0                : W1 column (Linear(1,U) weight)
      col  base + 1                : b1
      cols base + 2 .. base + L    : biases of hidden layers 2..L
      col  base + L + 1            : w_out column (head weight, transposed)
      col  base + L + 2 (row 0)    : b_out scalar
    """
    U = num_units
    L = len(params) - 1                               # number of hidden layers
    base = (L - 1) * U
    cols = base + L + 3
    rows_pad = _round_up(U, 8)
    cols_pad = _round_up(cols, 128)

    p = jnp.zeros((rows_pad, cols_pad), jnp.float32)

    w1, b1 = params[0]                                # (U, 1), (U,)
    assert w1.shape == (U, 1), "FeatureNN forward expects in_features == 1"
    p = p.at[:U, base].set(w1[:, 0].astype(jnp.float32))
    p = p.at[:U, base + 1].set(b1.astype(jnp.float32))

    for j in range(L - 1):                            # hidden layers 2..L
        wk, bk = params[1 + j]                        # (U, U), (U,)
        p = p.at[:U, j * U:(j + 1) * U].set(wk.astype(jnp.float32))
        p = p.at[:U, base + 2 + j].set(bk.astype(jnp.float32))

    w_out, b_out = params[-1]                         # (1, U), (1,)
    p = p.at[:U, base + L + 1].set(w_out[0, :].astype(jnp.float32))
    p = p.at[0, base + L + 2].set(b_out[0].astype(jnp.float32))
    return p


def _featurenn_kernel(num_layers, num_units, chunk, x_ref, p_ref, o_ref):
    """MLP hot path.

    x_ref : (1, block_b)        batch tile, batch on lanes
    p_ref : (rows_pad, cols_pad) packed parameters (<= 16 KiB)
    o_ref : (1, block_b)        lane-dense output tile
    """
    U, L = num_units, num_layers
    base = (L - 1) * U

    # Unpack parameters ONCE per grid step (hoisted out of the chunk loop).
    p = p_ref[...]
    w1 = p[:U, base:base + 1]                                   # (U, 1)
    b1 = p[:U, base + 1:base + 2]                               # (U, 1)
    whs = [p[:U, j * U:(j + 1) * U] for j in range(L - 1)]      # (U, U) each
    bhs = [p[:U, base + 2 + j:base + 3 + j] for j in range(L - 1)]
    w_out = p[:U, base + L + 1:base + L + 2]                    # (U, 1)
    b_out = p[:1, base + L + 2:base + L + 3]                    # (1, 1)

    num_chunks = o_ref.shape[-1] // chunk

    def body(c, carry):
        off = pl.multiple_of(c * chunk, chunk)
        x = x_ref[:, pl.ds(off, chunk)].astype(jnp.float32)     # (1, chunk)
        # Linear(1, U): pure VPU broadcast (avoids a K=1 MXU matmul) + ReLU.
        h = jnp.maximum(w1 * x + b1, 0.0)                       # (U, chunk)
        # Hidden Linear(U, U): MXU matmul with N = chunk (lane-dense) + ReLU.
        for wk, bk in zip(whs, bhs):
            h = jnp.dot(wk, h, preferred_element_type=jnp.float32) + bk
            h = jnp.maximum(h, 0.0)
        # Head Linear(U, 1): VPU multiply + sublane (XLU) reduce, no N=1 matmul.
        out = jnp.sum(w_out * h, axis=0, keepdims=True) + b_out  # (1, chunk)
        o_ref[:, pl.ds(off, chunk)] = out.astype(o_ref.dtype)
        return carry

    # Fully unrolled inner loop over spill-free 512-lane chunks (LLO-visible).
    lax.fori_loop(0, num_chunks, body, 0, unroll=True)


def feature_nn_forward(inputs, params, *, block_b=4096, chunk=512,
                       vmem_limit_bytes=None):
    """Pallas forward for FeatureNN.

    inputs: (B,) float32 — a batch of scalar feature values (arbitrary B)
    params: PyTorch-layout list of (W, b); see pack_params.
    returns: (B, 1) float32
    """
    B = inputs.shape[0]
    assert chunk % 128 == 0, "chunk must be lane-aligned (multiple of 128)"
    assert block_b % chunk == 0, "block_b must be a multiple of chunk"

    num_units = params[0][0].shape[0]
    num_layers = len(params) - 1

    # No padding copy: reshape is metadata-only; Pallas handles the ragged
    # last block (masked writeback of the out-of-bounds lanes).
    x2 = inputs.astype(jnp.float32).reshape(1, B)
    packed = pack_params(params, num_units)

    kernel = functools.partial(_featurenn_kernel, num_layers, num_units, chunk)
    num_tiles = pl.cdiv(B, block_b)

    out = pl.pallas_call(
        kernel,
        out_shape=jax.ShapeDtypeStruct((1, B), jnp.float32),
        grid=(num_tiles,),
        in_specs=[
            pl.BlockSpec((1, block_b), lambda i: (0, i)),
            # Single packed parameter block; block index never changes, so it
            # stays resident in VMEM across grid steps.
            pl.BlockSpec(packed.shape, lambda i: (0, 0)),
        ],
        out_specs=pl.BlockSpec((1, block_b), lambda i: (0, i)),
        compiler_params=pltpu.CompilerParams(
            dimension_semantics=("parallel",),      # megacore-shardable on v7x
            vmem_limit_bytes=vmem_limit_bytes,
        ),
    )(x2, packed)

    return out.reshape(B, 1)                        # (B, 1), matches torch output


def init_featurenn_params(key, in_features, num_units, num_layers):
    """PyTorch nn.Linear default init (U(+-1/sqrt(fan_in))), PyTorch layout:
    W:(out,in), b:(out,) for every layer including the Linear(num_units,1) head."""
    params = []
    sizes = [in_features] + [num_units] * num_layers + [1]
    for in_f, out_f in zip(sizes[:-1], sizes[1:]):
        key, kw, kb = jax.random.split(key, 3)
        bound = 1.0 / (in_f ** 0.5)
        w = jax.random.uniform(kw, (out_f, in_f), jnp.float32, -bound, bound)
        b = jax.random.uniform(kb, (out_f,), jnp.float32, -bound, bound)
        params.append((w, b))
    return params


def feature_nn_reference(inputs, params):
    """Pure-JAX reference of the same forward pass (standard batch-major math)."""
    h = inputs.reshape(-1, 1).astype(jnp.float32)   # torch: inputs.unsqueeze(1)
    for (w, b) in params[:-1]:
        h = jnp.maximum(h @ w.T + b, 0.0)           # PyTorch: x W^T + b, ReLU
    w_out, b_out = params[-1]                       # (1, num_units), (1,)
    return h @ w_out.T + b_out                      # (B, 1)


if __name__ == "__main__":
    # Batch of scalar feature values, shape (B,); output (B, 1).
    B = 1000            # not a multiple of the tile -> exercises ragged last block
    in_features = 1
    num_units = 32
    num_layers = 2

    key = jax.random.PRNGKey(0)
    key, k_in = jax.random.split(key)
    inputs = jax.random.normal(k_in, (B,), jnp.float32)
    params = init_featurenn_params(key, in_features, num_units, num_layers)

    # block_b=512 -> 2 grid steps (minimum for 2-TensorCore utilization on v7x);
    # each step is one spill-free 512-lane chunk. For large B use the defaults
    # (block_b=4096, chunk=512) so per-grid-step overhead is amortized 8x.
    out = feature_nn_forward(inputs, params, block_b=512, chunk=512)
    out = jax.block_until_ready(out)

    ref = feature_nn_reference(inputs, params)
    assert out.shape == (B, 1), out.shape
    assert jnp.allclose(out, ref, atol=1e-5, rtol=1e-5), "mismatch vs reference"

    print("KERNEL_OK")
</pallas_src>

<mosaic_0001>
module attributes {stable_mosaic.version = 11 : i64} {
  func.func @_featurenn_kernel(%arg0: i32, %arg1: memref<1x512xf32, #tpu.memory_space<vmem>>, %arg2: memref<32x128xf32, #tpu.memory_space<vmem>>, %arg3: memref<1x512xf32, #tpu.memory_space<vmem>>) attributes {dimension_semantics = [#tpu.dimension_semantics<parallel>], iteration_bounds = array<i64: 2>, scalar_prefetch = 0 : i64, scratch_operands = 0 : i64, tpu.core_type = #tpu.core_type<tc>, window_params = [{transform_indices = @transform_0, window_bounds = array<i64: 1, 512>}, {pipeline_mode = #tpu.pipeline_mode<synchronous>, transform_indices = @transform_1, window_bounds = array<i64: 32, 128>}, {transform_indices = @transform_2, window_bounds = array<i64: 1, 512>}]} {
    %c0 = arith.constant 0 : index
    %c0_0 = arith.constant 0 : index
    %0 = vector.load %arg2[%c0, %c0_0] : memref<32x128xf32, #tpu.memory_space<vmem>>, vector<32x128xf32>
    %1 = vector.extract_strided_slice %0 {offsets = [0, 32], sizes = [32, 1], strides = [1, 1]} : vector<32x128xf32> to vector<32x1xf32>
    %2 = vector.extract_strided_slice %0 {offsets = [0, 33], sizes = [32, 1], strides = [1, 1]} : vector<32x128xf32> to vector<32x1xf32>
    %3 = vector.extract_strided_slice %0 {offsets = [0, 0], sizes = [32, 32], strides = [1, 1]} : vector<32x128xf32> to vector<32x32xf32>
    %4 = vector.extract_strided_slice %0 {offsets = [0, 34], sizes = [32, 1], strides = [1, 1]} : vector<32x128xf32> to vector<32x1xf32>
    %5 = vector.extract_strided_slice %0 {offsets = [0, 35], sizes = [32, 1], strides = [1, 1]} : vector<32x128xf32> to vector<32x1xf32>
    %6 = vector.extract_strided_slice %0 {offsets = [0, 36], sizes = [1, 1], strides = [1, 1]} : vector<32x128xf32> to vector<1x1xf32>
    %c0_i32 = arith.constant 0 : i32
    %c512_i32 = arith.constant 512 : i32
    %7 = arith.muli %c0_i32, %c512_i32 : i32
    %8 = tpu.assume_multiple %7, 512 : i32
    %c0_1 = arith.constant 0 : index
    %9 = arith.index_cast %8 : i32 to index
    %10 = vector.load %arg1[%c0_1, %9] : memref<1x512xf32, #tpu.memory_space<vmem>>, vector<1x512xf32>
    %11 = vector.broadcast %1 : vector<32x1xf32> to vector<32x512xf32>
    %12 = vector.broadcast %10 : vector<1x512xf32> to vector<32x512xf32>
    %13 = arith.mulf %11, %12 : vector<32x512xf32>
    %14 = vector.broadcast %2 : vector<32x1xf32> to vector<32x512xf32>
    %15 = arith.addf %13, %14 : vector<32x512xf32>
    %cst = arith.constant 0.000000e+00 : f32
    %16 = vector.broadcast %cst : f32 to vector<32x512xf32>
    %17 = arith.maximumf %15, %16 : vector<32x512xf32>
    %cst_2 = arith.constant dense<0.000000e+00> : vector<32x512xf32>
    %18 = tpu.matmul %3, %17, %cst_2 {dimension_numbers = #tpu.dot_dimension_numbers<[1], [0], [0], [1], [0, 0, 1, 1], [], []>} : vector<32x32xf32>, vector<32x512xf32>, vector<32x512xf32> -> vector<32x512xf32>
    %19 = vector.broadcast %4 : vector<32x1xf32> to vector<32x512xf32>
    %20 = arith.addf %18, %19 : vector<32x512xf32>
    %cst_3 = arith.constant 0.000000e+00 : f32
    %21 = vector.broadcast %cst_3 : f32 to vector<32x512xf32>
    %22 = arith.maximumf %20, %21 : vector<32x512xf32>
    %23 = vector.broadcast %5 : vector<32x1xf32> to vector<32x512xf32>
    %24 = arith.mulf %23, %22 : vector<32x512xf32>
    %cst_4 = arith.constant dense<0.000000e+00> : vector<512xf32>
    %25 = vector.multi_reduction <add>, %24, %cst_4 [0] : vector<32x512xf32> to vector<512xf32>
    %26 = vector.shape_cast %25 : vector<512xf32> to vector<1x512xf32>
    %27 = vector.broadcast %6 : vector<1x1xf32> to vector<1x512xf32>
    %28 = arith.addf %26, %27 : vector<1x512xf32>
    %c0_5 = arith.constant 0 : index
    %29 = arith.index_cast %8 : i32 to index
    %30 = vector.load %arg3[%c0_5, %29] : memref<1x512xf32, #tpu.memory_space<vmem>>, vector<1x512xf32>
    tpu.vector_store %arg3[%c0_5, %29], %28 {strides = array<i32>} : memref<1x512xf32, #tpu.memory_space<vmem>>, vector<1x512xf32>,
    %c1_i32 = arith.constant 1 : i32
    return
  }
  func.func @transform_0(%arg0: i32) -> (i32, i32) {
    %c0_i32 = arith.constant 0 : i32
    %c0_i32_0 = arith.constant 0 : i32
    return %c0_i32, %arg0 : i32, i32
  }
  func.func @transform_1(%arg0: i32) -> (i32, i32) {
    %c0_i32 = arith.constant 0 : i32
    %c0_i32_0 = arith.constant 0 : i32
    %c0_i32_1 = arith.constant 0 : i32
    return %c0_i32, %c0_i32_0 : i32, i32
  }
  func.func @transform_2(%arg0: i32) -> (i32, i32) {
    %c0_i32 = arith.constant 0 : i32
    %c0_i32_0 = arith.constant 0 : i32
    return %c0_i32, %arg0 : i32, i32
  }
}

</mosaic_0001>

<bundles_post_ra>
// kernel: tpu_custom_call.1
= control target key start
LH: loop header
LB: loop body
LE: loop exit
PB: predicated region body
PF: predicated region fallthrough
CT: control target
= control target key end

     0   :  { %7 = vsyncpa [#allocation3], 0  ;;  %s1085_s0 = inlined_call_operand.hbm [shape: f32[1,1000], index: 0, kind: input, shape index: {}]   ;;  %s1086_s1 = inlined_call_operand.hbm [shape: f32[32,128], index: 1, kind: input, shape index: {}]   ;;  %s1087_s2 = inlined_call_operand.hbm [shape: f32[1,1000], index: 2, kind: output, shape index: {}]  }
   0x1   :  { %9 = vsyncpa [#allocation3 + $0x1], 0 }
   0x2   :  { %10 = vsyncpa [#allocation6], 0 }
   0x3   :  { %11 = vsyncpa [#allocation4], 0 }
   0x4   :  { %13 = vsyncpa [#allocation4 + $0x1], 0  ;;  %s888_s9 = smov 0   ;;  %s890_s10 = smov 0  }
   0x5   :  { %s892_s11 = smov 0   ;;  %s894_s12 = smov 0  }
   0x6 LB: > { %s108_s15 = sshll.u32 %s1086_s1, 4  ;;  %s912_s16 = sadd.s32 4294967295, %s863_s12   ;;  %s863_s12 = sphi %s894_s12, %s1097_s12   ;;  %s859_s11 = sphi %s892_s11, %s1096_s11   ;;  %s855_s10 = sphi %s890_s10, %s1095_s10   ;;  %s851_s9 = sphi %s888_s9, %s1094_s9   ;;  %s109_s15 = int_to_ptr.hbm [resolvable:$true] %s108_s15 }
   0x7   : > { %p627_p0 = scmp.ge.s32.totalorder %s863_s12, 1  ;;  %p40_p1 = scmp.eq.s32.totalorder %s912_s16, 0 }
   0x8   : > { %p97_p2 = scmp.lt.s32.totalorder %s863_s12, 3  ;;  %s865_s18 = smov [#allocation5]  }
   0x9   : > { %s110_s19 = sshll.u32 %s865_s18, 4  ;;  %s866_s20 = smov 128   ;;  %s111_s19 = int_to_ptr.vmem [resolvable:$true] %s110_s19 }
   0xa   : > { %p917_p3 = pnand %p627_p0, %p97_p2  ;;  %s867_s21 = smov 8  }
   0xb   : > { %s626_s22 = sadd.s32 4294967294, %s863_s12   ;;  %s928_s23 = sadd.s32 1, %s863_s12  }
   0xc   : > { %p664_p4 = pneg %p917_p3  ;;  %s26_s24 = sadd.s32 1, %s859_s11 }
   0xd   : > { %s23_s25 = ssub.s32 %s863_s12, %s928_s23  ;;  %p33_p7 = scmp.ne.s32.totalorder %s859_s11, %s855_s10 }
   0xe   : > { %p665_p6 = pnand %p664_p4, %p40_p1  ;;  %p24_p8 = scmp.eq.s32.totalorder %s23_s25, 0 }
   0xf   : > { %p34_p9 = scmp.eq.s32.totalorder %s863_s12, 0  ;;  %p39_p10 = scmp.ne.s32.totalorder %s855_s10, %s851_s9 }
  0x10   : > { %667 = dma.hbm_to_vmem [thread:$0]  (!%p665_p6), %s109_s15, 512, %s111_s19, [#allocation6], %s866_s20, %s866_s20, %s867_s21  }
  0x11   : > { %p84_p11 = scmp.eq.s32.totalorder %s912_s16, 1  ;;  %p944_p12 = por %p40_p1, %p39_p10 }
  0x12   : > { %s940_s26 = scalar_select %p24_p8, %s859_s11, %s26_s24  }
  0x13   : > { %p948_p13 = por %p84_p11, %p33_p7  ;;  %p90_p0 = scmp.eq.s32.totalorder %s626_s22, 1 }
  0x14   : > { %p35_p2 = por %p34_p9, %p33_p7  ;;  %s124_s29 = sand.u32 1, %s859_s11  }
  0x15   : > { %p953_p4 = por %p90_p0, %p39_p10  ;;  %p677_p6 = scmp.lt.s32.totalorder %s863_s12, 2 }
  0x16   : > { %s630_s3 = sshll.u32 %s124_s29, 2  ;;  %s631_s4 = sshll.u32 %s863_s12, 2 }
  0x17   : > { %s132_s7 = scalar_lea.hbm %s1085_s0, %s631_s4  ;;  %s128_s13 = scalar_lea.vmem [#allocation2], %s630_s3 }
  0x18   : > { %s134_s8 = sshll.u32 %s132_s7, 4  ;;  %s136_s14 = sshll.u32 %s128_s13, 4  ;;  %s135_s8 = int_to_ptr.hbm [resolvable:$true] %s134_s8  ;;  %s137_s14 = int_to_ptr.vmem [resolvable:$true] %s136_s14 }
  0x19   : > { %p962_p8 = pnand %p677_p6, %p35_p2  ;;  %s125_s18 = scalar_lea.sflag [#allocation3], %s124_s29 }
  0x1a   : > { %s763_s19 = sshra.s32 %s135_s8, 4  ;;  %s770_s24 = scalar_lea.hbm %s1085_s0, 8  ;;  %s764_s19 = int_to_ptr.hbm [resolvable:$true] %s763_s19 }
  0x1b   : > { %s765_s20 = scalar_lea.hbm %s764_s19, 4  ;;  %p767_p9 = pneg %p962_p8 }
  0x1c   : > { %p766_p7 = scmp.ne.s32.totalorder %s764_s19, %s765_s20  ;;  %p771_p0 = scmp.lt.s32.totalorder %s764_s19, %s1085_s0 }
  0x1d   : > { %p772_p2 = scmp.lt.s32.totalorder %s770_s24, %s765_s20 }
  0x1e   : > { %p768_p10 = pnand %p767_p9, %p766_p7 }
  0x1f   : > { %p773_p6 = por %p772_p2, %p771_p0 }
  0x20   : > { %p769_p11 = pneg %p768_p10 }
  0x22   : > { %p774_p5 = pnand %p773_p6, %p769_p11 }
  0x24   : > { %777 = shalt.err (!%p774_p5)
}
  0x25   : > { %671 = dma.hbm_to_vmem [thread:$0]  (!%p962_p8), %s135_s8, 64, %s137_s14, %s125_s18  }
  0x26   : > { %145 = sbr.rel (%p917_p3) target bundleno = 375 (0x177), region = 28  ;;  %s979_s29 = sand.u32 (!%p917_p3), 1, %s855_s10  }
  0x27   : > { %s633_s4 = sshll.u32 (!%p917_p3), %s979_s29, 2  ;;  %s148_s5 = scalar_lea.sflag (!%p917_p3), [#allocation3], %s979_s29 }
  0x28   : > { %s151_s6 = scalar_lea.vmem (!%p917_p3), [#allocation2], %s633_s4 }
  0x2b   : > { %838 = dma.done.wait (%p944_p12), %s148_s5, 64  }
  0x2c   : > { %840 = vsyncadd (%p944_p12), %s148_s5, 4294967232 }
  0x2d   : > { %842 = dma.done.wait (%p40_p1), [#allocation6], 512  }
  0x2e   : > { %844 = vsyncadd (%p40_p1), [#allocation6], 4294966784  ;;  %v868_v0 = vmov 32   ;;  %v869_v1 = vmov 33   ;;  %v993_v2 = vld [vmem:[#allocation5 + $0x18] sm:$0xff]  ;;  %v997_v3 = vld [vmem:[#allocation5 + $0x10] sm:$0xff] }
  0x2f   : > { %720 = vset.pattern.permute.xlu0 %v868_v0  ;;  %721 = vset.pattern.permute.xlu1 %v869_v1  ;;  %v1000_v4 = vld [vmem:[#allocation5 + $0x8] sm:$0xff]  ;;  %v1004_v5 = vld [vmem:[#allocation5] sm:$0xff]  ;;  %v184_v6 = vld [vmem:[%s151_s6] sm:$0xf]  ;;  %v870_v26 = vmov 34   ;;  %v871_v44 = vmov 35  }
  0x30   : > { %723 = vset.pattern.permute.xlu2 %v869_v1  ;;  %202 = vperm.xlu0 %720, %v993_v2   ;;  %v206_v7 = vperm.slane %v184_v6, 0  ;;  %v207_v8 = vperm.slane %v184_v6, 1  ;;  %v208_v9 = vperm.slane %v184_v6, 2  ;;  %v209_v10 = vperm.slane %v184_v6, 3  ;;  %s653_s17 = sshll.u32 %s912_s16, 2  ;;  %s177_s13 = scalar_lea.vmem [#allocation7], %s633_s4 }
  0x31   : > { %243 = vperm.xlu1 %721, %v993_v2   ;;  %239 = vperm.xlu2 %723, %v997_v3   ;;  %vm294_vm0 = vcmask 261120   ;;  %s541_s8 = scalar_lea.hbm %s1087_s2, %s653_s17  ;;  %vm518_vm1 = vcmask 1040384   ;;  %vm520_vm2 = vcmask 1042434   ;;  %s543_s16 = sshll.u32 %s177_s13, 4  ;;  %vm522_vm3 = vcmask 1041408   ;;  %s544_s16 = int_to_ptr.vmem [resolvable:$true] %s543_s16 }
  0x32   : > { %s545_s14 = sshll.u32 %s541_s8, 4  ;;  %s531_s15 = scalar_lea.sflag [#allocation4], %s979_s29  ;;  %s546_s14 = int_to_ptr.hbm [resolvable:$true] %s545_s14 }
  0x33   : > { %s807_s18 = sshra.s32 %s546_s14, 4  ;;  %s813_s22 = scalar_lea.hbm %s1087_s2, 8  ;;  %s808_s18 = int_to_ptr.hbm [resolvable:$true] %s807_s18 }
  0x34   : > { %s809_s19 = scalar_lea.hbm %s808_s18, 4  ;;  %p814_p12 = scmp.lt.s32.totalorder %s808_s18, %s1087_s2 }
  0x35   : > { %p810_p1 = scmp.ne.s32.totalorder %s808_s18, %s809_s19  ;;  %p815_p8 = scmp.lt.s32.totalorder %s813_s22, %s809_s19 }
  0x37   : > { %p811_p3 = pnand %p810_p1, %p948_p13  ;;  %p816_p7 = por %p815_p8, %p814_p12 }
  0x38   : > { %197 = vperm.xlu0 %720, %v997_v3  }
  0x39   : > { %722 = vset.pattern.permute.xlu1 %v868_v0  ;;  %724 = vset.pattern.permute.xlu2 %v868_v0  ;;  %p812_p5 = pneg %p811_p3 }
  0x3a   : > { %192 = vperm.xlu1 %722, %v1000_v4   ;;  %187 = vperm.xlu2 %724, %v1004_v5  }
  0x3b   : > { %p817_p9 = pnand %p816_p7, %p812_p5 }
  0x40   : > { %725 = vset.pattern.permute.xlu0 %v869_v1 }
  0x41   : > { %235 = vperm.xlu0 %725, %v1000_v4  }
  0x42   : > { %726 = vset.pattern.permute.xlu1 %v869_v1  ;;  %727 = vset.pattern.permute.xlu2 %v870_v26 }
  0x43   : > { %231 = vperm.xlu1 %726, %v1004_v5   ;;  %279 = vperm.xlu2 %727, %v1004_v5  }
  0x49   : > { %729 = vset.pattern.permute.xlu0 %v870_v26 }
  0x4a   : > { %291 = vperm.xlu0 %729, %v993_v2  }
  0x4b   : > { %728 = vset.pattern.permute.xlu1 %v870_v26  ;;  %287 = vperm.xlu2 %727, %v997_v3  }
  0x4c   : > { %283 = vperm.xlu1 %728, %v1000_v4  }
  0x53   : > { %731 = vset.pattern.permute.xlu2 %v871_v44 }
  0x54   : > { %730 = vset.pattern.permute.xlu1 %v871_v44  ;;  %440 = vperm.xlu2 %731, %v1000_v4  }
  0x55   : > { %436 = vperm.xlu1 %730, %v1004_v5  }
  0x5c   : > { %448 = vperm.xlu2 %731, %v993_v2  }
  0x5d   : > { %444 = vperm.xlu1 %730, %v997_v3  }
  0x8b   : > { %v240_v17 = vpop.permute.xlu2 %239 }
  0x94   : > { %v188_v37 = vpop.permute.xlu2 %187 }
  0x95   : > { %v214_v42 = vmul.f32 %v206_v7, %v188_v37  ;;  %v215_v43 = vmul.f32 %v207_v8, %v188_v37  ;;  %v216_v46 = vmul.f32 %v208_v9, %v188_v37  ;;  %v217_v47 = vmul.f32 %v209_v10, %v188_v37 }
  0xa2   : > { %v203_v11 = vpop.permute.xlu0 %202 }
  0xa3   : > { %v244_v12 = vpop.permute.xlu1 %243  ;;  %v226_v13 = vmul.f32 %v206_v7, %v203_v11  ;;  %v227_v14 = vmul.f32 %v207_v8, %v203_v11  ;;  %v228_v15 = vmul.f32 %v208_v9, %v203_v11  ;;  %v229_v16 = vmul.f32 %v209_v10, %v203_v11 }
  0xa5   : > { %v258_v18 = vadd.f32 %v244_v12, %v226_v13  ;;  %v259_v19 = vadd.f32 %v244_v12, %v227_v14  ;;  %v260_v20 = vadd.f32 %v244_v12, %v228_v15  ;;  %v261_v21 = vadd.f32 %v244_v12, %v229_v16 }
  0xa7   : > { %v274_v22 = vmax.f32 %v258_v18, 0.0  ;;  %v275_v23 = vmax.f32 %v259_v19, 0.0  ;;  %v276_v24 = vmax.f32 %v260_v20, 0.0  ;;  %v277_v25 = vmax.f32 %v261_v21, 0.0 }
  0xa9   : > { %315 = vmatpush.msra.mxu0 %v274_v22  ;;  %344 = vmatpush.msra.mxu1 %v275_v23 }
  0xaa   : > { %373 = vmatpush.msra.mxu2 %v276_v24  ;;  %402 = vmatpush.msra.mxu3 %v277_v25  ;;  %v198_v27 = vpop.permute.xlu0 %197 }
  0xab   : > { %v222_v29 = vmul.f32 %v206_v7, %v198_v27  ;;  %v223_v30 = vmul.f32 %v207_v8, %v198_v27  ;;  %v224_v31 = vmul.f32 %v208_v9, %v198_v27  ;;  %v225_v32 = vmul.f32 %v209_v10, %v198_v27 }
  0xac   : > { %v193_v28 = vpop.permute.xlu1 %192 }
  0xad   : > { %v254_v33 = vadd.f32 %v240_v17, %v222_v29  ;;  %v255_v34 = vadd.f32 %v240_v17, %v223_v30  ;;  %v256_v35 = vadd.f32 %v240_v17, %v224_v31  ;;  %v257_v36 = vadd.f32 %v240_v17, %v225_v32 }
  0xae   : > { %v218_v45 = vmul.f32 %v206_v7, %v193_v28  ;;  %v219_v48 = vmul.f32 %v207_v8, %v193_v28  ;;  %v220_v49 = vmul.f32 %v208_v9, %v193_v28  ;;  %v221_v50 = vmul.f32 %v209_v10, %v193_v28 }
  0xaf   : > { %v270_v38 = vmax.f32 %v254_v33, 0.0  ;;  %v271_v39 = vmax.f32 %v255_v34, 0.0  ;;  %v272_v40 = vmax.f32 %v256_v35, 0.0  ;;  %v273_v41 = vmax.f32 %v257_v36, 0.0 }
  0xb0   : > { %v872_v9 = vmov 36  }
  0xb1   : > { %316 = vmatpush.msra.mxu0 %v270_v38  ;;  %345 = vmatpush.msra.mxu1 %v271_v39 }
  0xb2   : > { %374 = vmatpush.msra.mxu2 %v272_v40  ;;  %403 = vmatpush.msra.mxu3 %v273_v41 }
  0xb3   : > { %v236_v51 = vpop.permute.xlu0 %235  ;;  %732 = vset.pattern.permute.xlu0 %v872_v9 }
  0xb4   : > { %v250_v53 = vadd.f32 %v236_v51, %v218_v45  ;;  %v251_v54 = vadd.f32 %v236_v51, %v219_v48  ;;  %v252_v55 = vadd.f32 %v236_v51, %v220_v49  ;;  %v253_v56 = vadd.f32 %v236_v51, %v221_v50  ;;  %504 = vperm.xlu0 %732, %v1004_v5  }
  0xb5   : > { %v232_v52 = vpop.permute.xlu1 %231 }
  0xb6   : > { %v246_v57 = vadd.f32 %v232_v52, %v214_v42  ;;  %v247_v58 = vadd.f32 %v232_v52, %v215_v43  ;;  %v248_v59 = vadd.f32 %v232_v52, %v216_v46  ;;  %v249_v60 = vadd.f32 %v232_v52, %v217_v47 }
  0xb7   : > { %v266_v61 = vmax.f32 %v250_v53, 0.0  ;;  %v267_v62 = vmax.f32 %v251_v54, 0.0  ;;  %v268_v63 = vmax.f32 %v252_v55, 0.0  ;;  %v269_v0 = vmax.f32 %v253_v56, 0.0 }
  0xb8   : > { %v262_v1 = vmax.f32 %v246_v57, 0.0  ;;  %v263_v6 = vmax.f32 %v247_v58, 0.0  ;;  %v264_v7 = vmax.f32 %v248_v59, 0.0  ;;  %v265_v8 = vmax.f32 %v249_v60, 0.0 }
  0xb9   : > { %317 = vmatpush.msra.mxu0 %v266_v61  ;;  %346 = vmatpush.msra.mxu1 %v267_v62 }
  0xba   : > { %375 = vmatpush.msra.mxu2 %v268_v63  ;;  %404 = vmatpush.msra.mxu3 %v269_v0 }
  0xbb   : > { %318 = vmatpush.msra.mxu0 %v262_v1  ;;  %347 = vmatpush.msra.mxu1 %v263_v6 }
  0xbc   : > { %376 = vmatpush.msra.mxu2 %v264_v7  ;;  %405 = vmatpush.msra.mxu3 %v265_v8  ;;  %v292_v38 = vpop.permute.xlu0 %291 }
  0xbd   : > { %636 = vmatmul.msk.f32.vlgmr.msra.gmra.mxu0 %vm294_vm0, %v1004_v5  ;;  %640 = vmatmul.msk.f32.vlgmr.msra.gmra.mxu1 %vm294_vm0, %v1004_v5 }
  0xbe   : > { %644 = vmatmul.msk.f32.vlgmr.msra.gmra.mxu2 %vm294_vm0, %v1004_v5  ;;  %648 = vmatmul.msk.f32.vlgmr.msra.gmra.mxu3 %vm294_vm0, %v1004_v5  ;;  %v284_v11 = vpop.permute.xlu1 %283 }
  0xc5   : > { %637 = vmatmul.msk.f32.gmra.mxu0 %vm294_vm0, %v1000_v4  ;;  %641 = vmatmul.msk.f32.gmra.mxu1 %vm294_vm0, %v1000_v4 }
  0xc6   : > { %645 = vmatmul.msk.f32.gmra.mxu2 %vm294_vm0, %v1000_v4  ;;  %649 = vmatmul.msk.f32.gmra.mxu3 %vm294_vm0, %v1000_v4  ;;  %v280_v4 = vpop.permute.xlu2 %279 }
  0xc7   : > { %v437_v16 = vpop.permute.xlu1 %436 }
  0xcd   : > { %638 = vmatmul.msk.f32.gmra.mxu0 %vm294_vm0, %v997_v3  ;;  %642 = vmatmul.msk.f32.gmra.mxu1 %vm294_vm0, %v997_v3 }
  0xce   : > { %646 = vmatmul.msk.f32.gmra.mxu2 %vm294_vm0, %v997_v3  ;;  %650 = vmatmul.msk.f32.gmra.mxu3 %vm294_vm0, %v997_v3  ;;  %v288_v15 = vpop.permute.xlu2 %287 }
  0xcf   : > { %v445_v37 = vpop.permute.xlu1 %444 }
  0xd5   : > { %639 = vmatmul.msk.f32.gmra.mxu0 %vm294_vm0, %v993_v2  ;;  %643 = vmatmul.msk.f32.gmra.mxu1 %vm294_vm0, %v993_v2 }
  0xd6   : > { %647 = vmatmul.msk.f32.gmra.mxu2 %vm294_vm0, %v993_v2  ;;  %651 = vmatmul.msk.f32.gmra.mxu3 %vm294_vm0, %v993_v2  ;;  %v441_v30 = vpop.permute.xlu2 %440 }
  0xde   : > { %v449_v63 = vpop.permute.xlu2 %448 }
 0x13a   : > { %v320_v5 = vpop.f32.mrf.mxu0  ;;  %v349_v10 = vpop.f32.mrf.mxu1 }
 0x13b   : > { %v321_v17 = vadd.f32 %v320_v5, %v280_v4  ;;  %v350_v22 = vadd.f32 %v349_v10, %v280_v4 }
 0x13d   : > { %v419_v26 = vmax.f32 %v321_v17, 0.0  ;;  %v420_v29 = vmax.f32 %v350_v22, 0.0 }
 0x13f   : > { %v451_v39 = vmul.f32 %v437_v16, %v419_v26  ;;  %v452_v44 = vmul.f32 %v437_v16, %v420_v29 }
 0x141   : > { %v378_v12 = vpop.f32.mrf.mxu2  ;;  %v407_v13 = vpop.f32.mrf.mxu3 }
 0x142   : > { %v323_v14 = vpop.f32.mrf.mxu0  ;;  %v352_v3 = vpop.f32.mrf.mxu1  ;;  %v379_v33 = vadd.f32 %v378_v12, %v280_v4  ;;  %v408_v34 = vadd.f32 %v407_v13, %v280_v4 }
 0x143   : > { %v324_v18 = vadd.f32 %v323_v14, %v284_v11  ;;  %v353_v19 = vadd.f32 %v352_v3, %v284_v11 }
 0x144   : > { %v421_v53 = vmax.f32 %v379_v33, 0.0  ;;  %v422_v54 = vmax.f32 %v408_v34, 0.0 }
 0x145   : > { %v423_v27 = vmax.f32 %v324_v18, 0.0  ;;  %v424_v28 = vmax.f32 %v353_v19, 0.0 }
 0x146   : > { %v453_v4 = vmul.f32 %v437_v16, %v421_v53  ;;  %v454_v5 = vmul.f32 %v437_v16, %v422_v54 }
 0x147   : > { %v455_v40 = vmul.f32 %v441_v30, %v423_v27  ;;  %v456_v41 = vmul.f32 %v441_v30, %v424_v28 }
 0x149   : > { %v381_v20 = vpop.f32.mrf.mxu2  ;;  %v410_v21 = vpop.f32.mrf.mxu3  ;;  %v467_v57 = vadd.f32 %v455_v40, %v451_v39  ;;  %v476_v58 = vadd.f32 %v456_v41, %v452_v44 }
 0x14a   : > { %v326_v23 = vpop.f32.mrf.mxu0  ;;  %v355_v24 = vpop.f32.mrf.mxu1  ;;  %v382_v35 = vadd.f32 %v381_v20, %v284_v11  ;;  %v411_v36 = vadd.f32 %v410_v21, %v284_v11 }
 0x14b   : > { %v327_v25 = vadd.f32 %v326_v23, %v288_v15  ;;  %v356_v2 = vadd.f32 %v355_v24, %v288_v15 }
 0x14c   : > { %v425_v55 = vmax.f32 %v382_v35, 0.0  ;;  %v426_v56 = vmax.f32 %v411_v36, 0.0 }
 0x14d   : > { %v427_v31 = vmax.f32 %v327_v25, 0.0  ;;  %v428_v32 = vmax.f32 %v356_v2, 0.0 }
 0x14e   : > { %v457_v8 = vmul.f32 %v441_v30, %v425_v55  ;;  %v458_v9 = vmul.f32 %v441_v30, %v426_v56 }
 0x14f   : > { %v459_v49 = vmul.f32 %v445_v37, %v427_v31  ;;  %v460_v50 = vmul.f32 %v445_v37, %v428_v32 }
 0x150   : > { %v485_v20 = vadd.f32 %v457_v8, %v453_v4  ;;  %v494_v21 = vadd.f32 %v458_v9, %v454_v5 }
 0x151   : > { %v384_v42 = vpop.f32.mrf.mxu2  ;;  %v413_v43 = vpop.f32.mrf.mxu3  ;;  %v468_v0 = vadd.f32 %v467_v57, %v459_v49  ;;  %v477_v1 = vadd.f32 %v476_v58, %v460_v50 }
 0x152   : > { %v385_v45 = vadd.f32 %v384_v42, %v288_v15  ;;  %v414_v46 = vadd.f32 %v413_v43, %v288_v15  ;;  %v329_v47 = vpop.f32.mrf.mxu0  ;;  %v358_v48 = vpop.f32.mrf.mxu1 }
 0x153   : > { %v330_v51 = vadd.f32 %v329_v47, %v292_v38  ;;  %v359_v52 = vadd.f32 %v358_v48, %v292_v38  ;;  %v505_v42 = vpop.permute.xlu0 %504 }
 0x154   : > { %v429_v61 = vmax.f32 %v385_v45, 0.0  ;;  %v430_v62 = vmax.f32 %v414_v46, 0.0 }
 0x155   : > { %v431_v59 = vmax.f32 %v330_v51, 0.0  ;;  %v432_v60 = vmax.f32 %v359_v52, 0.0  ;;  %v525_v52 = vlaneseq }
 0x156   : > { %v461_v14 = vmul.f32 %v445_v37, %v429_v61  ;;  %v462_v3 = vmul.f32 %v445_v37, %v430_v62 }
 0x157   : > { %v463_v6 = vmul.f32 %v449_v63, %v431_v59  ;;  %v464_v7 = vmul.f32 %v449_v63, %v432_v60  ;;  %vm527_vm4 = vcmp.lt.s32.totalorder %v525_v52, 512 }
 0x158   : > { %v486_v2 = vadd.f32 %v485_v20, %v461_v14  ;;  %v495_v26 = vadd.f32 %v494_v21, %v462_v3 }
 0x159   : > { %v469_v10 = vadd.f32 %v468_v0, %v463_v6  ;;  %v478_v11 = vadd.f32 %v477_v1, %v464_v7  ;;  %v387_v12 = vpop.f32.mrf.mxu2  ;;  %v416_v13 = vpop.f32.mrf.mxu3 }
 0x15a   : > { %v388_v15 = vadd.f32 %v387_v12, %v292_v38  ;;  %v417_v17 = vadd.f32 %v416_v13, %v292_v38 }
 0x15b   : > { %v470_v18 = vrot.slane %v469_v10, 4  ;;  %v479_v19 = vrot.slane %v478_v11, 4 }
 0x15c   : > { %v433_v22 = vmax.f32 %v388_v15, 0.0  ;;  %v434_v23 = vmax.f32 %v417_v17, 0.0 }
 0x15d   : > { %v471_v24 = vadd.f32 %v470_v18, %v469_v10  ;;  %v480_v25 = vadd.f32 %v479_v19, %v478_v11 }
 0x15e   : > { %v465_v27 = vmul.f32 %v449_v63, %v433_v22  ;;  %v466_v16 = vmul.f32 %v449_v63, %v434_v23 }
 0x15f   : > { %v481_v28 = vrot.slane %v480_v25, 2  ;;  %v472_v31 = vrot.slane %v471_v24, 2 }
 0x160   : > { %v487_v29 = vadd.f32 %v486_v2, %v465_v27  ;;  %v496_v30 = vadd.f32 %v495_v26, %v466_v16 }
 0x161   : > { %v482_v32 = vadd.f32 %v481_v28, %v480_v25  ;;  %v473_v38 = vadd.f32 %v472_v31, %v471_v24 }
 0x162   : > { %v488_v33 = vrot.slane %v487_v29, 4  ;;  %v497_v34 = vrot.slane %v496_v30, 4 }
 0x163   : > { %v483_v35 = vrot.slane %v482_v32, 1  ;;  %v474_v43 = vrot.slane %v473_v38, 1 }
 0x164   : > { %v489_v36 = vadd.f32 %v488_v33, %v487_v29  ;;  %v498_v37 = vadd.f32 %v497_v34, %v496_v30 }
 0x165   : > { %v484_v41 = vadd.f32 %v483_v35, %v482_v32  ;;  %v475_v49 = vadd.f32 %v474_v43, %v473_v38 }
 0x166   : > { %v490_v39 = vrot.slane %v489_v36, 2  ;;  %v499_v40 = vrot.slane %v498_v37, 2 }
 0x167   : > { %v508_v48 = vadd.f32 %v505_v42, %v484_v41  ;;  %v507_v56 = vadd.f32 %v505_v42, %v475_v49 }
 0x168   : > { %v491_v44 = vadd.f32 %v490_v39, %v489_v36  ;;  %v500_v45 = vadd.f32 %v499_v40, %v498_v37 }
 0x169   : > { %v515_v55 = vrot.slane %v508_v48, 7 }
 0x16a   : > { %v492_v46 = vrot.slane %v491_v44, 1  ;;  %v501_v47 = vrot.slane %v500_v45, 1 }
 0x16b   : > { %v519_v59 = vsel %vm518_vm1, %v507_v56, %v515_v55 }
 0x16c   : > { %v493_v50 = vadd.f32 %v492_v46, %v491_v44  ;;  %v502_v51 = vadd.f32 %v501_v47, %v500_v45 }
 0x16e   : > { %v509_v53 = vadd.f32 %v505_v42, %v493_v50  ;;  %v510_v54 = vadd.f32 %v505_v42, %v502_v51 }
 0x170   : > { %v516_v57 = vrot.slane %v509_v53, 6  ;;  %v517_v58 = vrot.slane %v510_v54, 5 }
 0x172   : > { %v521_v60 = vsel %vm520_vm2, %v516_v57, %v517_v58 }
 0x173   : > { %v523_v61 = vsel %vm522_vm3, %v519_v59, %v521_v60 }
 0x174   : > { %529 = vst.msk [vmem:[%s177_s13] sm:$0xf] %vm527_vm4, %v523_v61 }
 0x175   : > { %820 = shalt.err (!%p817_p9)
}
 0x176   : > { %662 = dma.vmem_to_hbm [thread:$0]  (%p948_p13), %s544_s16, 64, %s546_s14, %s531_s15  }
 0x177 PF: > { %s557_s3 = sand.u32 1, %s851_s9   ;;  %p1093_p10 = scmp.ge.s32.totalorder %s863_s12, 2 }
 0x178   : > { %s558_s29 = scalar_lea.sflag [#allocation4], %s557_s3 }
 0x179   : > { %p673_p11 = pnand %p1093_p10, %p953_p4 }
 0x17b   : > { %p674_p0 = pneg %p673_p11 }
 0x17d   : > { %846 = dma.done.wait (%p674_p0), %s558_s29, 64  }
 0x17e   : > { %848 = vsyncadd (%p674_p0), %s558_s29, 4294967232  ;;  %p16_p2 = scmp.ge.s32.totalorder %s928_s23, 4   ;;  %s1094_s9 = smov %s855_s10 }
 0x17f   : > { %s1095_s10 = smov %s859_s11  ;;  %s1096_s11 = smov %s940_s26 }
 0x180   : > { %s1097_s12 = smov %s928_s23  ;;  %18 = sbr.rel (!%p16_p2) target bundleno = 6 (0x6), region = 77 }
 0x185   :  { %564 = vsyncpa [#allocation3], 1 }
 0x186   :  { %566 = vsyncpa [#allocation3 + $0x1], 1 }
 0x187   :  { %567 = vsyncpa [#allocation6], 1 }
 0x188   :  { %568 = vsyncpa [#allocation4], 1 }
 0x189   :  { %570 = vsyncpa [#allocation4 + $0x1], 1 }

</bundles_post_ra>
